<compile_context>
chip_gen: v6e
topology: v6e:2x2x1
jax: 0.10.0
libtpu: 0.0.40
codegen_flags: <defaults>
</compile_context>

<pallas_src>
import jax
import jax.numpy as jnp
from jax.experimental import pallas as pl
from jax.experimental.pallas import tpu as pltpu


def _round_up(n, m):
    return ((n + m - 1) // m) * m


def _mlp_kernel(x_ref, w1_ref, b1_ref, w2_ref, b2_ref, o_ref):
    # fc1: (TILE_B, D_in) @ (D_in, H) + (1, H); f32 accumulation on the MXU.
    h = jnp.dot(x_ref[...], w1_ref[...], preferred_element_type=jnp.float32)
    h = h + b1_ref[...].astype(jnp.float32)
    # leaky_relu (PyTorch default negative_slope = 0.01), elementwise in f32.
    h = jnp.where(h > 0, h, 0.01 * h)
    # TODO(synk): dropout1(p=0.5) is identity in eval mode; training-mode masking
    # (pltpu.prng_random_bits) is intentionally not applied here.
    # fc4: (TILE_B, H) @ (H, D_out) + (1, D_out).  (astype is a no-op for f32
    # weights; it would downcast the f32 intermediate if weights became bf16.)
    y = jnp.dot(h.astype(w2_ref.dtype), w2_ref[...],
                preferred_element_type=jnp.float32)
    y = y + b2_ref[...].astype(jnp.float32)
    o_ref[...] = y.astype(o_ref.dtype)


def regression_model1_forward(x, w1, b1, w2, b2, *, tile_b=2048):
    """RegressionModel1.forward (eval mode).

    x : (B, input_dim); w1: (input_dim, hidden); b1: (1, hidden)
    w2: (hidden, output_dim); b2: (1, output_dim) -> (B, output_dim)
    """
    B, d_in = x.shape
    hidden = w1.shape[1]
    d_out = w2.shape[1]

    # Batch tile: multiple of 8 sublanes, capped by (rounded-up) batch so small
    # batches use a single tile.  No host-side padding: the grid is cdiv(B, tile)
    # and Pallas masks the ragged last block (OOB output writes are dropped).
    tile_b_eff = min(tile_b, _round_up(B, 8))
    grid = (pl.cdiv(B, tile_b_eff),)

    def _nbytes(a):
        return a.size * jnp.dtype(a.dtype).itemsize

    cost = pl.CostEstimate(
        flops=2 * B * (d_in * hidden + hidden * d_out),
        transcendentals=0,
        bytes_accessed=(_nbytes(x) + _nbytes(w1) + _nbytes(b1)
                        + _nbytes(w2) + _nbytes(b2)
                        + B * d_out * jnp.dtype(x.dtype).itemsize),
    )

    return pl.pallas_call(
        _mlp_kernel,
        out_shape=jax.ShapeDtypeStruct((B, d_out), x.dtype),
        grid=grid,
        in_specs=[
            pl.BlockSpec((tile_b_eff, d_in), lambda i: (i, 0)),   # x tile (streamed)
            pl.BlockSpec((d_in, hidden), lambda i: (0, 0)),       # w1 resident
            pl.BlockSpec((1, hidden), lambda i: (0, 0)),          # b1 resident
            pl.BlockSpec((hidden, d_out), lambda i: (0, 0)),      # w2 resident
            pl.BlockSpec((1, d_out), lambda i: (0, 0)),           # b2 resident
        ],
        out_specs=pl.BlockSpec((tile_b_eff, d_out), lambda i: (i, 0)),
        compiler_params=pltpu.CompilerParams(
            dimension_semantics=("parallel",)),  # shard batch grid across TCs (v7x)
        cost_estimate=cost,
    )(x, w1, b1, w2, b2)


def _ref_forward(x, w1, b1, w2, b2):
    h = x @ w1 + b1
    h = jnp.where(h > 0, h, 0.01 * h)
    return h @ w2 + b2


if __name__ == "__main__":
    # Small shapes consistent with the module: batch=8, input_dim=32,
    # reg_hidden_dim=64, output_dim=16.
    B, D_IN, H, D_OUT = 8, 32, 64, 16

    key = jax.random.PRNGKey(0)
    kx, kw1, kb1, kw2, kb2 = jax.random.split(key, 5)

    x = jax.random.normal(kx, (B, D_IN), dtype=jnp.float32)

    # Deterministic PyTorch-like (uniform) init for the Linear layers.
    bound1 = 1.0 / (D_IN ** 0.5)
    w1 = jax.random.uniform(kw1, (D_IN, H), minval=-bound1, maxval=bound1,
                            dtype=jnp.float32)
    b1 = jax.random.uniform(kb1, (1, H), minval=-bound1, maxval=bound1,
                            dtype=jnp.float32)
    bound2 = 1.0 / (H ** 0.5)
    w2 = jax.random.uniform(kw2, (H, D_OUT), minval=-bound2, maxval=bound2,
                            dtype=jnp.float32)
    b2 = jax.random.uniform(kb2, (1, D_OUT), minval=-bound2, maxval=bound2,
                            dtype=jnp.float32)

    # Single-tile path (small batch).
    out = regression_model1_forward(x, w1, b1, w2, b2)
    out = jax.block_until_ready(out)
    ref = _ref_forward(x, w1, b1, w2, b2)
    assert out.shape == (B, D_OUT)
    assert jnp.allclose(out, ref, atol=1e-5, rtol=1e-5)

    # Gridded path: batch > tile and not a tile multiple -> exercises the
    # ragged last block (masked OOB writes) with no wrapper-side padding.
    B2 = 264
    x2 = jax.random.normal(jax.random.PRNGKey(1), (B2, D_IN), dtype=jnp.float32)
    out2 = regression_model1_forward(x2, w1, b1, w2, b2, tile_b=128)
    out2 = jax.block_until_ready(out2)
    ref2 = _ref_forward(x2, w1, b1, w2, b2)
    assert out2.shape == (B2, D_OUT)
    assert jnp.allclose(out2, ref2, atol=1e-5, rtol=1e-5)

    print("KERNEL_OK")
</pallas_src>

<mosaic_0001>
module attributes {stable_mosaic.version = 11 : i64} {
  func.func @_mlp_kernel(%arg0: i32, %arg1: memref<8x32xf32, #tpu.memory_space<vmem>>, %arg2: memref<32x64xf32, #tpu.memory_space<vmem>>, %arg3: memref<1x64xf32, #tpu.memory_space<vmem>>, %arg4: memref<64x16xf32, #tpu.memory_space<vmem>>, %arg5: memref<1x16xf32, #tpu.memory_space<vmem>>, %arg6: memref<8x16xf32, #tpu.memory_space<vmem>>) attributes {dimension_semantics = [#tpu.dimension_semantics<parallel>], iteration_bounds = array<i64: 1>, scalar_prefetch = 0 : i64, scratch_operands = 0 : i64, tpu.core_type = #tpu.core_type<tc>, window_params = [{transform_indices = @transform_0, window_bounds = array<i64: 8, 32>}, {pipeline_mode = #tpu.pipeline_mode<synchronous>, transform_indices = @transform_1, window_bounds = array<i64: 32, 64>}, {pipeline_mode = #tpu.pipeline_mode<synchronous>, transform_indices = @transform_2, window_bounds = array<i64: 1, 64>}, {pipeline_mode = #tpu.pipeline_mode<synchronous>, transform_indices = @transform_3, window_bounds = array<i64: 64, 16>}, {pipeline_mode = #tpu.pipeline_mode<synchronous>, transform_indices = @transform_4, window_bounds = array<i64: 1, 16>}, {transform_indices = @transform_5, window_bounds = array<i64: 8, 16>}]} {
    %c0 = arith.constant 0 : index
    %c0_0 = arith.constant 0 : index
    %0 = vector.load %arg1[%c0, %c0_0] : memref<8x32xf32, #tpu.memory_space<vmem>>, vector<8x32xf32>
    %c0_1 = arith.constant 0 : index
    %c0_2 = arith.constant 0 : index
    %1 = vector.load %arg2[%c0_1, %c0_2] : memref<32x64xf32, #tpu.memory_space<vmem>>, vector<32x64xf32>
    %cst = arith.constant dense<0.000000e+00> : vector<8x64xf32>
    %2 = tpu.matmul %0, %1, %cst {dimension_numbers = #tpu.dot_dimension_numbers<[1], [0], [0], [1], [0, 0, 1, 1], [], []>} : vector<8x32xf32>, vector<32x64xf32>, vector<8x64xf32> -> vector<8x64xf32>
    %c0_3 = arith.constant 0 : index
    %c0_4 = arith.constant 0 : index
    %3 = vector.load %arg3[%c0_3, %c0_4] : memref<1x64xf32, #tpu.memory_space<vmem>>, vector<1x64xf32>
    %4 = vector.broadcast %3 : vector<1x64xf32> to vector<8x64xf32>
    %5 = arith.addf %2, %4 : vector<8x64xf32>
    %cst_5 = arith.constant 0.000000e+00 : f32
    %6 = vector.broadcast %cst_5 : f32 to vector<8x64xf32>
    %7 = arith.cmpf ogt, %5, %6 : vector<8x64xf32>
    %cst_6 = arith.constant 0.00999999977 : f32
    %8 = vector.broadcast %cst_6 : f32 to vector<8x64xf32>
    %9 = arith.mulf %8, %5 : vector<8x64xf32>
    %10 = arith.select %7, %5, %9 : vector<8x64xi1>, vector<8x64xf32>
    %c0_7 = arith.constant 0 : index
    %c0_8 = arith.constant 0 : index
    %11 = vector.load %arg4[%c0_7, %c0_8] : memref<64x16xf32, #tpu.memory_space<vmem>>, vector<64x16xf32>
    %cst_9 = arith.constant dense<0.000000e+00> : vector<8x16xf32>
    %12 = tpu.matmul %10, %11, %cst_9 {dimension_numbers = #tpu.dot_dimension_numbers<[1], [0], [0], [1], [0, 0, 1, 1], [], []>} : vector<8x64xf32>, vector<64x16xf32>, vector<8x16xf32> -> vector<8x16xf32>
    %c0_10 = arith.constant 0 : index
    %c0_11 = arith.constant 0 : index
    %13 = vector.load %arg5[%c0_10, %c0_11] : memref<1x16xf32, #tpu.memory_space<vmem>>, vector<1x16xf32>
    %14 = vector.broadcast %13 : vector<1x16xf32> to vector<8x16xf32>
    %15 = arith.addf %12, %14 : vector<8x16xf32>
    %c0_12 = arith.constant 0 : index
    %c0_13 = arith.constant 0 : index
    %16 = vector.load %arg6[%c0_12, %c0_13] : memref<8x16xf32, #tpu.memory_space<vmem>>, vector<8x16xf32>
    tpu.vector_store %arg6[%c0_12, %c0_13], %15 {strides = array<i32>} : memref<8x16xf32, #tpu.memory_space<vmem>>, vector<8x16xf32>,
    return
  }
  func.func @transform_0(%arg0: i32) -> (i32, i32) {
    %c0_i32 = arith.constant 0 : i32
    %c0_i32_0 = arith.constant 0 : i32
    return %arg0, %c0_i32 : i32, i32
  }
  func.func @transform_1(%arg0: i32) -> (i32, i32) {
    %c0_i32 = arith.constant 0 : i32
    %c0_i32_0 = arith.constant 0 : i32
    %c0_i32_1 = arith.constant 0 : i32
    return %c0_i32, %c0_i32_0 : i32, i32
  }
  func.func @transform_2(%arg0: i32) -> (i32, i32) {
    %c0_i32 = arith.constant 0 : i32
    %c0_i32_0 = arith.constant 0 : i32
    %c0_i32_1 = arith.constant 0 : i32
    return %c0_i32, %c0_i32_0 : i32, i32
  }
  func.func @transform_3(%arg0: i32) -> (i32, i32) {
    %c0_i32 = arith.constant 0 : i32
    %c0_i32_0 = arith.constant 0 : i32
    %c0_i32_1 = arith.constant 0 : i32
    return %c0_i32, %c0_i32_0 : i32, i32
  }
  func.func @transform_4(%arg0: i32) -> (i32, i32) {
    %c0_i32 = arith.constant 0 : i32
    %c0_i32_0 = arith.constant 0 : i32
    %c0_i32_1 = arith.constant 0 : i32
    return %c0_i32, %c0_i32_0 : i32, i32
  }
  func.func @transform_5(%arg0: i32) -> (i32, i32) {
    %c0_i32 = arith.constant 0 : i32
    %c0_i32_0 = arith.constant 0 : i32
    return %arg0, %c0_i32 : i32, i32
  }
}

</mosaic_0001>

<bundles_post_ra>
// kernel: tpu_custom_call.1
= control target key start
LH: loop header
LB: loop body
LE: loop exit
PB: predicated region body
PF: predicated region fallthrough
CT: control target
= control target key end

     0   :  { %v288_v1 = vmov 0.0   ;;  %vm289_vm0 = vmmov 0   ;;  %s371_s0 = inlined_call_operand.vmem [shape: f32[8,32], index: 0, kind: input, shape index: {}]   ;;  %s372_s1 = inlined_call_operand.vmem [shape: f32[32,64], index: 1, kind: input, shape index: {}]   ;;  %s373_s2 = inlined_call_operand.vmem [shape: f32[1,64], index: 2, kind: input, shape index: {}]   ;;  %s374_s3 = inlined_call_operand.vmem [shape: f32[64,16], index: 3, kind: input, shape index: {}]   ;;  %s375_s4 = inlined_call_operand.vmem [shape: f32[1,16], index: 4, kind: input, shape index: {}]   ;;  %s376_s5 = inlined_call_operand.hbm [shape: f32[8,16], index: 5, kind: output, shape index: {}]  }
   0x1   :  { %v25_v0 = vld [vmem:[%s372_s1 + $0x18] sm:$0xff]  ;;  %233 = vmatprep.subr.mxu0 %v288_v1  ;;  %v24_v2 = vld [vmem:[%s372_s1 + $0x10] sm:$0xff]  ;;  %241 = vmatprep.mubr.msk.f32.mxu0 %vm289_vm0, %v288_v1  ;;  %v23_v5 = vld [vmem:[%s372_s1 + $0x8] sm:$0xff] }
   0x2   :  { %v117_v3 = vld [vmem:[%s374_s3 + $0x38] sm:$0xff]  ;;  %234 = vmatpush3.msra.mxu0 %v25_v0  ;;  %244 = vmatprep.subr.mxu1 %v288_v1  ;;  %v116_v4 = vld [vmem:[%s374_s3 + $0x30] sm:$0xff] }
   0x3   :  { %235 = vmatprep.subr.mxu0 %v288_v1  ;;  %245 = vmatpush3.msra.mxu1 %v117_v3 }
   0x4   :  { %10 = vsyncpa [#allocation3], 0  ;;  %236 = vmatpush3.msra.mxu0 %v24_v2  ;;  %246 = vmatprep.subr.mxu1 %v288_v1  ;;  %v115_v6 = vld [vmem:[%s374_s3 + $0x28] sm:$0xff]  ;;  %v22_v7 = vld [vmem:[%s372_s1] sm:$0xff]  ;;  %vm33_vm1 = vcmask 261120   ;;  %vm125_vm3 = vcmask 523264  }
   0x5   :  { %237 = vmatprep.subr.mxu0 %v288_v1  ;;  %247 = vmatpush3.msra.mxu1 %v116_v4  ;;  %v21_v8 = vld [vmem:[%s371_s0] sm:$0xff]  ;;  %v113_v10 = vld [vmem:[%s374_s3 + $0x18] sm:$0xff]  ;;  %v112_v11 = vld [vmem:[%s374_s3 + $0x10] sm:$0xff]  ;;  %s290_s21 = smov [#allocation2]   ;;  %vm199_vm4 = vcmask 130048  }
   0x6   :  { %238 = vmatpush3.msra.mxu0 %v23_v5  ;;  %248 = vmatprep.subr.mxu1 %v288_v1  ;;  %v114_v9 = vld [vmem:[%s374_s3 + $0x20] sm:$0xff]  ;;  %v111_v12 = vld [vmem:[%s374_s3 + $0x8] sm:$0xff] }
   0x7   :  { %239 = vmatprep.subr.mxu0 %v288_v1  ;;  %249 = vmatpush3.msra.mxu1 %v115_v6  ;;  %v110_v13 = vld [vmem:[%s374_s3] sm:$0xff]  ;;  %s207_s3 = sshll.u32 %s290_s21, 4  ;;  %s208_s3 = int_to_ptr.vmem [resolvable:$true] %s207_s3 }
   0x8   :  { %240 = vmatpush3.msra.mxu0 %v22_v7  ;;  %250 = vmatprep.subr.mxu1 %v288_v1  ;;  %v215_v14 = vld [vmem:[%s373_s2] ss:$0 sm:$0xff]  ;;  %s266_s2 = scalar_lea.vmem %s208_s3, 128  ;;  %p271_p1 = scmp.lt.s32.totalorder %s208_s3, %s208_s3 }
   0x9   :  { %242 = vmatmul.mubr.msk.f32.vlgmr.msra.gmra.mxu0 %vm33_vm1, %v21_v8  ;;  %251 = vmatpush3.msra.mxu1 %v114_v9  ;;  %v217_v20 = vld [vmem:[%s375_s4] ss:$0 sm:$0xff]  ;;  %p267_p0 = scmp.ne.s32.totalorder %s208_s3, %s266_s2  ;;  %p272_p2 = scmp.lt.s32.totalorder %s266_s2, %s266_s2 }
   0xa   :  { %252 = vmatprep.subr.mxu1 %v288_v1  ;;  %260 = vmatprep.mubr.msk.f32.mxu1 %vm289_vm0, %v288_v1 }
   0xb   :  { %253 = vmatpush3.msra.mxu1 %v113_v10  ;;  %p273_p3 = por %p272_p2, %p271_p1 }
   0xc   :  { %254 = vmatprep.subr.mxu1 %v288_v1 }
   0xd   :  { %255 = vmatpush3.msra.mxu1 %v112_v11  ;;  %p274_p4 = pnand %p273_p3, %p267_p0 }
   0xe   :  { %256 = vmatprep.subr.mxu1 %v288_v1 }
   0xf   :  { %257 = vmatpush3.msra.mxu1 %v111_v12 }
  0x10   :  { %258 = vmatprep.subr.mxu1 %v288_v1 }
  0x11   :  { %259 = vmatpush3.msra.mxu1 %v110_v13 }
  0xc9   :  { %v103_v15 = vpop.f32.mrf.mxu0 }
  0xca   :  { %v104_v16 = vadd.f32 %v215_v14, %v103_v15 }
  0xcb   :  { %v243_v17 = vpop.f32.mrf.mxu0 }
  0xcc   :  { %vm107_vm2 = vcmp.gt.f32.partialorder %v104_v16, 0.0  ;;  %v108_v18 = vmul.f32 0.01, %v104_v16 }
  0xce   :  { %v109_v19 = vsel %vm107_vm2, %v104_v16, %v108_v18 }
  0xcf   :  { %261 = vmatmul.mubr.msk.f32.vlgmr.msra.gmra.mxu1 %vm125_vm3, %v109_v19 }
 0x18f   :  { %v195_v21 = vpop.f32.mrf.mxu1 }
 0x190   :  { %v196_v22 = vadd.f32 %v217_v20, %v195_v21 }
 0x191   :  { %v262_v23 = vpop.f32.mrf.mxu1 }
 0x192   :  { %200 = vst.msk [vmem:[#allocation2] sm:$0xff] %vm199_vm4, %v196_v22 }
 0x193   :  { %277 = shalt.err (!%p274_p4)
}
 0x194   :  { %210 = dma.vmem_to_hbm [thread:$0]  %s208_s3, 128, %s376_s5, [#allocation3]  }
 0x195   :  { %286 = dma.done.wait [#allocation3], 128  }
 0x196   :  { %287 = vsyncadd [#allocation3], 4294967168 }
 0x197   :  { %214 = vsyncpa [#allocation3], 1 }

</bundles_post_ra>
